<compile_context>
chip_gen: v6e
topology: v6e:2x2x1
jax: 0.10.0
libtpu: 0.0.40
codegen_flags: <defaults>
</compile_context>

<pallas_src>
import math

import jax
import jax.numpy as jnp
from jax.experimental import pallas as pl
from jax.experimental.pallas import tpu as pltpu


def _round_up(x, m):
    return ((x + m - 1) // m) * m


def mog_logprob_kernel(z_ref, c1_ref, c2_ref, bias_ref, out_ref):
    """One batch tile (batch along the lane axis).

    z_ref:    (M, TB)      latents, batch on lanes (lane-dense loads)
    c1_ref:   (Kp, M) f32  mu * inv_var            (resident; Kp = K padded to 8)
    c2_ref:   (Kp, M) f32  -0.5 * inv_var          (resident)
    bias_ref: (Kp, 1) f32  per-component constant  (resident; padded rows = -1e30)
    out_ref:  (1, TB) f32  log p(z)                (lane-dense store)
    """
    z = z_ref[...].astype(jnp.float32)                       # (M, TB)

    # Expanded quadratic on the MXU: two (Kp,M) x (M,TB) f32 matmuls.
    # HIGHEST precision avoids bf16 demotion of the f32 operands.
    s = jnp.dot(c2_ref[...], z * z,
                preferred_element_type=jnp.float32,
                precision=jax.lax.Precision.HIGHEST)          # (Kp, TB)
    s = s + jnp.dot(c1_ref[...], z,
                    preferred_element_type=jnp.float32,
                    precision=jax.lax.Precision.HIGHEST)
    s = s + bias_ref[...]                                     # (Kp, TB) + (Kp, 1)

    # logsumexp over components (sublane axis, full 8-sublane vreg occupancy).
    smax = jnp.max(s, axis=0, keepdims=True)                  # (1, TB)
    acc = jnp.sum(jnp.exp(s - smax), axis=0, keepdims=True)   # (1, TB)
    out_ref[...] = smax + jnp.log(acc)


def mog_prior_log_prob(z, means, log_stds, logits, *, tb=16384, z_transposed=False):
    """Mixture-of-Gaussians log_prob(z).

    z: (B, M) (default) or (M, B) if z_transposed=True.  Returns (B,).
    """
    if z_transposed:
        M, B = z.shape
        z_t = z
    else:
        B, M = z.shape
        # TODO(synk): this transpose is an extra HBM pass XLA can't fuse into the
        # pallas_call; producers that can emit z as (M, B) should pass
        # z_transposed=True to skip it entirely.
        z_t = z.T
    K = means.shape[0]
    k_pad = _round_up(K, 8)

    # ---- parameter-only precompute (once in the wrapper, never per grid step) ----
    means32 = means.astype(jnp.float32)
    log_stds32 = log_stds.astype(jnp.float32)
    inv_var = jnp.exp(-2.0 * log_stds32)                      # (K, M)
    c2 = -0.5 * inv_var                                       # (K, M)
    c1 = means32 * inv_var                                    # (K, M)
    bias = (jax.nn.log_softmax(logits.astype(jnp.float32))
            - jnp.sum(log_stds32, axis=-1)
            - 0.5 * jnp.sum(means32 * means32 * inv_var, axis=-1)
            - 0.5 * M * math.log(2.0 * math.pi))              # (K,)
    # Pad components to a full 8-sublane tile; padded rows contribute exp() = 0.
    c1 = jnp.pad(c1, ((0, k_pad - K), (0, 0)))
    c2 = jnp.pad(c2, ((0, k_pad - K), (0, 0)))
    bias = jnp.pad(bias, (0, k_pad - K), constant_values=-1e30)[:, None]  # (Kp, 1)

    # ---- batch tiling: batch on the lane axis -> lane-dense loads and stores ----
    b128 = _round_up(B, 128)
    tb = max(128, min(_round_up(tb, 128), b128))
    if 256 <= b128 <= tb:
        # Keep >= 2 grid steps so both TensorCores get work on megacore parts (v7x).
        tb = _round_up(pl.cdiv(b128, 2), 128)
    b_pad = _round_up(B, tb)
    if b_pad != B:
        z_t = jnp.pad(z_t, ((0, 0), (0, b_pad - B)))          # padded lanes -> log p(0), sliced off
    grid = (b_pad // tb,)

    # Scoped VMEM sized from the tile (z double-buffer + in-kernel f32 temps),
    # floored at the largest platform default and capped under v7x physical.
    z_item = jnp.dtype(z_t.dtype).itemsize
    vmem_limit = int(2 * M * tb * z_item + 4 * M * tb * 4 + (4 << 20))
    vmem_limit = min(max(vmem_limit, 32 << 20), 48 << 20)

    out = pl.pallas_call(
        mog_logprob_kernel,
        out_shape=jax.ShapeDtypeStruct((1, b_pad), jnp.float32),
        grid=grid,
        in_specs=[
            pl.BlockSpec((M, tb), lambda i: (0, i)),          # z tile (streamed over B)
            pl.BlockSpec((k_pad, M), lambda i: (0, 0)),       # C1 = mu*inv_var (resident)
            pl.BlockSpec((k_pad, M), lambda i: (0, 0)),       # C2 = -0.5*inv_var (resident)
            pl.BlockSpec((k_pad, 1), lambda i: (0, 0)),       # bias (resident)
        ],
        out_specs=pl.BlockSpec((1, tb), lambda i: (0, i)),
        compiler_params=pltpu.CompilerParams(
            dimension_semantics=("parallel",),
            vmem_limit_bytes=vmem_limit,
        ),
    )(z_t, c1, c2, bias)
    return out[0, :B]


def mog_prior_log_prob_ref(z, means, log_stds, logits):
    """Pure-JAX reference mirroring td.MixtureSameFamily.log_prob (direct form)."""
    stds = jnp.exp(log_stds)
    diff = z[:, None, :] - means[None, :, :]
    comp_lp = jnp.sum(
        -0.5 * (diff / stds[None]) ** 2 - log_stds[None]
        - 0.5 * math.log(2.0 * math.pi),
        axis=-1,
    )
    log_mix = jax.nn.log_softmax(logits)[None, :]
    return jax.scipy.special.logsumexp(comp_lp + log_mix, axis=-1)


if __name__ == "__main__":
    # Module __init__ shapes: M = latent dim, K = mixture components.
    M = 32   # latent dimension
    K = 4    # number of mixture components
    B = 8    # batch of latent samples to evaluate log_prob on

    key = jax.random.PRNGKey(0)
    k_means, k_z, k_z2 = jax.random.split(key, 3)

    # Deterministic parameter init matching the torch __init__:
    logits = jnp.zeros((K,), jnp.float32)                     # torch.zeros(K)
    means = jax.random.normal(k_means, (K, M), jnp.float32)   # torch.randn(K, M)
    log_stds = jnp.zeros((K, M), jnp.float32)                 # torch.zeros(K, M)

    # Small batch.
    z = jax.random.normal(k_z, (B, M), jnp.float32)
    lp = jax.block_until_ready(mog_prior_log_prob(z, means, log_stds, logits))
    lp_ref = mog_prior_log_prob_ref(z, means, log_stds, logits)
    assert lp.shape == (B,)
    assert jnp.allclose(lp, lp_ref, atol=1e-4, rtol=1e-4), (lp, lp_ref)

    # Non-aligned larger batch: exercises padding, a >=2-step parallel grid, and
    # the (M, B)-layout fast path that skips the wrapper transpose copy.
    B2 = 300
    z2 = jax.random.normal(k_z2, (B2, M), jnp.float32)
    lp2 = jax.block_until_ready(mog_prior_log_prob(z2, means, log_stds, logits))
    lp2_t = jax.block_until_ready(
        mog_prior_log_prob(z2.T, means, log_stds, logits, z_transposed=True))
    lp2_ref = mog_prior_log_prob_ref(z2, means, log_stds, logits)
    assert jnp.allclose(lp2, lp2_ref, atol=1e-4, rtol=1e-4), (lp2, lp2_ref)
    assert jnp.allclose(lp2_t, lp2_ref, atol=1e-4, rtol=1e-4), (lp2_t, lp2_ref)

    print("KERNEL_OK")
</pallas_src>

<mosaic_0001>
module attributes {stable_mosaic.version = 11 : i64} {
  func.func @mog_logprob_kernel(%arg0: i32, %arg1: memref<32x128xf32, #tpu.memory_space<vmem>>, %arg2: memref<8x32xf32, #tpu.memory_space<vmem>>, %arg3: memref<8x32xf32, #tpu.memory_space<vmem>>, %arg4: memref<8x1xf32, #tpu.memory_space<vmem>>, %arg5: memref<1x128xf32, #tpu.memory_space<vmem>>) attributes {dimension_semantics = [#tpu.dimension_semantics<parallel>], iteration_bounds = array<i64: 1>, scalar_prefetch = 0 : i64, scratch_operands = 0 : i64, tpu.core_type = #tpu.core_type<tc>, window_params = [{transform_indices = @transform_0, window_bounds = array<i64: 32, 128>}, {pipeline_mode = #tpu.pipeline_mode<synchronous>, transform_indices = @transform_1, window_bounds = array<i64: 8, 32>}, {pipeline_mode = #tpu.pipeline_mode<synchronous>, transform_indices = @transform_2, window_bounds = array<i64: 8, 32>}, {pipeline_mode = #tpu.pipeline_mode<synchronous>, transform_indices = @transform_3, window_bounds = array<i64: 8, 1>}, {transform_indices = @transform_4, window_bounds = array<i64: 1, 128>}]} {
    %c0 = arith.constant 0 : index
    %c0_0 = arith.constant 0 : index
    %0 = vector.load %arg1[%c0, %c0_0] : memref<32x128xf32, #tpu.memory_space<vmem>>, vector<32x128xf32>
    %c0_1 = arith.constant 0 : index
    %c0_2 = arith.constant 0 : index
    %1 = vector.load %arg3[%c0_1, %c0_2] : memref<8x32xf32, #tpu.memory_space<vmem>>, vector<8x32xf32>
    %2 = arith.mulf %0, %0 : vector<32x128xf32>
    %cst = arith.constant dense<0.000000e+00> : vector<8x128xf32>
    %3 = tpu.matmul %1, %2, %cst {dimension_numbers = #tpu.dot_dimension_numbers<[1], [0], [0], [1], [0, 0, 1, 1], [], []>, precision = #tpu.contract_precision<fp32>} : vector<8x32xf32>, vector<32x128xf32>, vector<8x128xf32> -> vector<8x128xf32>
    %c0_3 = arith.constant 0 : index
    %c0_4 = arith.constant 0 : index
    %4 = vector.load %arg2[%c0_3, %c0_4] : memref<8x32xf32, #tpu.memory_space<vmem>>, vector<8x32xf32>
    %cst_5 = arith.constant dense<0.000000e+00> : vector<8x128xf32>
    %5 = tpu.matmul %4, %0, %cst_5 {dimension_numbers = #tpu.dot_dimension_numbers<[1], [0], [0], [1], [0, 0, 1, 1], [], []>, precision = #tpu.contract_precision<fp32>} : vector<8x32xf32>, vector<32x128xf32>, vector<8x128xf32> -> vector<8x128xf32>
    %6 = arith.addf %3, %5 : vector<8x128xf32>
    %c0_6 = arith.constant 0 : index
    %c0_7 = arith.constant 0 : index
    %7 = vector.load %arg4[%c0_6, %c0_7] : memref<8x1xf32, #tpu.memory_space<vmem>>, vector<8x1xf32>
    %8 = vector.broadcast %7 : vector<8x1xf32> to vector<8x128xf32>
    %9 = arith.addf %6, %8 : vector<8x128xf32>
    %cst_8 = arith.constant dense<0xFF800000> : vector<128xf32>
    %10 = vector.multi_reduction <maximumf>, %9, %cst_8 [0] : vector<8x128xf32> to vector<128xf32>
    %11 = vector.shape_cast %10 : vector<128xf32> to vector<1x128xf32>
    %12 = vector.broadcast %11 : vector<1x128xf32> to vector<8x128xf32>
    %13 = arith.subf %9, %12 : vector<8x128xf32>
    %14 = math.exp %13 : vector<8x128xf32>
    %cst_9 = arith.constant dense<0.000000e+00> : vector<128xf32>
    %15 = vector.multi_reduction <add>, %14, %cst_9 [0] : vector<8x128xf32> to vector<128xf32>
    %16 = vector.shape_cast %15 : vector<128xf32> to vector<1x128xf32>
    %17 = math.log %16 : vector<1x128xf32>
    %18 = arith.addf %11, %17 : vector<1x128xf32>
    %c0_10 = arith.constant 0 : index
    %c0_11 = arith.constant 0 : index
    %19 = vector.load %arg5[%c0_10, %c0_11] : memref<1x128xf32, #tpu.memory_space<vmem>>, vector<1x128xf32>
    tpu.vector_store %arg5[%c0_10, %c0_11], %18 {strides = array<i32>} : memref<1x128xf32, #tpu.memory_space<vmem>>, vector<1x128xf32>,
    return
  }
  func.func @transform_0(%arg0: i32) -> (i32, i32) {
    %c0_i32 = arith.constant 0 : i32
    %c0_i32_0 = arith.constant 0 : i32
    return %c0_i32, %arg0 : i32, i32
  }
  func.func @transform_1(%arg0: i32) -> (i32, i32) {
    %c0_i32 = arith.constant 0 : i32
    %c0_i32_0 = arith.constant 0 : i32
    %c0_i32_1 = arith.constant 0 : i32
    return %c0_i32, %c0_i32_0 : i32, i32
  }
  func.func @transform_2(%arg0: i32) -> (i32, i32) {
    %c0_i32 = arith.constant 0 : i32
    %c0_i32_0 = arith.constant 0 : i32
    %c0_i32_1 = arith.constant 0 : i32
    return %c0_i32, %c0_i32_0 : i32, i32
  }
  func.func @transform_3(%arg0: i32) -> (i32, i32) {
    %c0_i32 = arith.constant 0 : i32
    %c0_i32_0 = arith.constant 0 : i32
    %c0_i32_1 = arith.constant 0 : i32
    return %c0_i32, %c0_i32_0 : i32, i32
  }
  func.func @transform_4(%arg0: i32) -> (i32, i32) {
    %c0_i32 = arith.constant 0 : i32
    %c0_i32_0 = arith.constant 0 : i32
    return %c0_i32, %arg0 : i32, i32
  }
}

</mosaic_0001>

<bundles_post_ra>
// kernel: tpu_custom_call.1
= control target key start
LH: loop header
LB: loop body
LE: loop exit
PB: predicated region body
PF: predicated region fallthrough
CT: control target
= control target key end

     0   :  { %9 = vsyncpa [#allocation3], 0  ;;  %s1591_s0 = inlined_call_operand.hbm [shape: f32[32,128], index: 0, kind: input, shape index: {}]   ;;  %s1592_s1 = inlined_call_operand.vmem [shape: f32[8,32], index: 1, kind: input, shape index: {}]   ;;  %s1593_s2 = inlined_call_operand.hbm [shape: f32[8,32], index: 2, kind: input, shape index: {}]   ;;  %s1594_s3 = inlined_call_operand.vmem [shape: f32[8,1], index: 3, kind: input, shape index: {}]   ;;  %s1595_s4 = inlined_call_operand.hbm [shape: f32[1,128], index: 4, kind: output, shape index: {}]  }
   0x1   :  { %10 = vsyncpa [#allocation6], 0 }
   0x2   :  { %11 = vsyncpa [#allocation4], 0  ;;  %s1344_s15 = smov [#allocation2]  }
   0x3   :  { %s17_s16 = sshll.u32 %s1344_s15, 4  ;;  %s18_s16 = int_to_ptr.vmem [resolvable:$true] %s17_s16 }
   0x4   :  { %s1286_s17 = scalar_lea.vmem %s18_s16, 512  ;;  %p1291_p1 = scmp.lt.s32.totalorder %s18_s16, %s18_s16 }
   0x5   :  { %p1287_p0 = scmp.ne.s32.totalorder %s18_s16, %s1286_s17  ;;  %p1292_p2 = scmp.lt.s32.totalorder %s1286_s17, %s1286_s17 }
   0x7   :  { %p1293_p3 = por %p1292_p2, %p1291_p1 }
   0x9   :  { %p1294_p4 = pnand %p1293_p3, %p1287_p0 }
   0xb   :  { %1297 = shalt.err (!%p1294_p4)
}
   0xc   :  { %s1345_s18 = smov 128   ;;  %s1346_s19 = smov 8  }
   0xd   :  { %23 = dma.hbm_to_vmem [thread:$0]  %s1591_s0, 512, %s18_s16, [#allocation3], %s1345_s18, %s1345_s18, %s1346_s19  }
   0xe   :  { %s1347_s22 = smov [#allocation5]  }
   0xf   :  { %s32_s23 = sshll.u32 %s1347_s22, 4  ;;  %s33_s23 = int_to_ptr.vmem [resolvable:$true] %s32_s23 }
  0x10   :  { %s1306_s24 = scalar_lea.vmem %s33_s23, 128  ;;  %p1311_p6 = scmp.lt.s32.totalorder %s33_s23, %s33_s23 }
  0x11   :  { %p1307_p5 = scmp.ne.s32.totalorder %s33_s23, %s1306_s24  ;;  %p1312_p7 = scmp.lt.s32.totalorder %s1306_s24, %s1306_s24 }
  0x13   :  { %p1313_p8 = por %p1312_p7, %p1311_p6 }
  0x15   :  { %p1314_p9 = pnand %p1313_p8, %p1307_p5 }
  0x17   :  { %1317 = shalt.err (!%p1314_p9)
}
  0x18   :  { %35 = dma.hbm_to_vmem [thread:$0]  %s1593_s2, 128, %s33_s23, [#allocation6]  }
  0x19   :  { %1338 = dma.done.wait [#allocation3], 512  }
  0x1a   :  { %1339 = vsyncadd [#allocation3], 4294966784 }
  0x1b   :  { %1340 = dma.done.wait [#allocation6], 128  }
  0x1c   :  { %1341 = vsyncadd [#allocation6], 4294967168  ;;  %v1348_v0 = vmov 0.0   ;;  %vm1349_vm0 = vmmov 0   ;;  %v1350_v1 = vmov 0   ;;  %vm54_vm1 = vcmask 261120  }
  0x1d   :  { %1133 = vmatprep.subr.mxu0 %v1348_v0  ;;  %1144 = vmatprep.subr.mxu1 %v1348_v0  ;;  %v47_v2 = vld [vmem:[#allocation2 + $0x18] sm:$0xff]  ;;  %v46_v3 = vld [vmem:[#allocation2 + $0x10] sm:$0xff]  ;;  %v1389_v4 = vld [vmem:[#allocation2 + $0x8] sm:$0xff] }
  0x1e   :  { %1141 = vmatprep.mubr.msk.f32.mxu0 %vm1349_vm0, %v1348_v0  ;;  %1152 = vmatprep.mubr.msk.f32.mxu1 %vm1349_vm0, %v1348_v0  ;;  %v1391_v5 = vand.u32 4294901760, %v47_v2  ;;  %v1393_v6 = vand.u32 4294901760, %v46_v3  ;;  %v1396_v7 = vand.u32 4294901760, %v1389_v4  ;;  %v1398_v8 = vld [vmem:[#allocation2] sm:$0xff]  ;;  %v52_v35 = vmul.f32 %v47_v2, %v47_v2 }
  0x1f   :  { %1273 = vset.pattern.permute.xlu0 %v1350_v1  ;;  %v53_v9 = vld [vmem:[%s1592_s1] sm:$0xff]  ;;  %v1404_v10 = vand.u32 4294901760, %v1398_v8  ;;  %v51_v37 = vmul.f32 %v46_v3, %v46_v3  ;;  %v50_v40 = vmul.f32 %v1389_v4, %v1389_v4  ;;  %v49_v42 = vmul.f32 %v1398_v8, %v1398_v8  ;;  %s1351_s1 = smov [#allocation7]  }
  0x20   :  { %v56_v11 = vsel %vm54_vm1, %v53_v9, 0  ;;  %v1031_v12 = vld [vmem:[%s1594_s3] sm:$0xff]  ;;  %1134 = vmatpush3.msra.mxu0 %v1391_v5  ;;  %v163_v13 = vsub.f32 %v47_v2, %v1391_v5  ;;  %v1415_v15 = vsub.f32 %v46_v3, %v1393_v6  ;;  %v1420_v16 = vsub.f32 %v1389_v4, %v1396_v7  ;;  %s1063_s3 = sshll.u32 %s1351_s1, 4  ;;  %s1064_s3 = int_to_ptr.vmem [resolvable:$true] %s1063_s3 }
  0x21   :  { %v1412_v14 = vand.u32 4294901760, %v56_v11  ;;  %1034 = vperm.xlu0 %1273, %v1031_v12   ;;  %1135 = vmatprep.subr.mxu0 %v1348_v0  ;;  %v1424_v17 = vsub.f32 %v1398_v8, %v1404_v10  ;;  %v48_v34 = vld [vmem:[#allocation5] sm:$0xff]  ;;  %v1463_v39 = vand.u32 4294901760, %v52_v35  ;;  %v1470_v41 = vand.u32 4294901760, %v51_v37  ;;  %s1318_s29 = scalar_lea.vmem %s1064_s3, 16  ;;  %s1322_s30 = scalar_lea.vmem %s1064_s3, 32 }
  0x22   :  { %1136 = vmatpush3.msra.mxu0 %v1393_v6  ;;  %v164_v18 = vand.u32 4294901760, %v163_v13  ;;  %v171_v20 = vand.u32 4294901760, %v1415_v15  ;;  %v178_v21 = vand.u32 4294901760, %v1420_v16  ;;  %v544_v36 = vsel %vm54_vm1, %v48_v34, 0  ;;  %p1319_p10 = scmp.ne.s32.totalorder %s1064_s3, %s1318_s29  ;;  %p1323_p11 = scmp.lt.s32.totalorder %s1064_s3, %s1064_s3 }
  0x23   :  { %v1428_v19 = vsub.f32 %v56_v11, %v1412_v14  ;;  %1137 = vmatprep.subr.mxu0 %v1348_v0  ;;  %v185_v22 = vand.u32 4294901760, %v1424_v17  ;;  %v1459_v38 = vand.u32 4294901760, %v544_v36  ;;  %v1478_v43 = vsub.f32 %v52_v35, %v1463_v39  ;;  %p1324_p12 = scmp.lt.s32.totalorder %s1322_s30, %s1318_s29 }
  0x24   :  { %1138 = vmatpush3.msra.mxu0 %v1396_v7  ;;  %v165_v23 = vsub.f32 %v163_v13, %v164_v18  ;;  %v172_v25 = vsub.f32 %v1415_v15, %v171_v20  ;;  %v179_v26 = vsub.f32 %v1420_v16, %v178_v21  ;;  %v1480_v44 = vand.u32 4294901760, %v50_v40 }
  0x25   :  { %v129_v24 = vand.u32 4294901760, %v1428_v19  ;;  %1139 = vmatprep.subr.mxu0 %v1348_v0  ;;  %v186_v30 = vsub.f32 %v1424_v17, %v185_v22  ;;  %v1483_v45 = vsub.f32 %v544_v36, %v1459_v38  ;;  %v1491_v46 = vsub.f32 %v51_v37, %v1470_v41  ;;  %p1325_p13 = por %p1324_p12, %p1323_p11 }
  0x26   :  { %1140 = vmatpush3.msra.mxu0 %v1404_v10  ;;  %v166_v27 = vand.u32 4294901760, %v165_v23  ;;  %v173_v29 = vand.u32 4294901760, %v172_v25  ;;  %v180_v32 = vand.u32 4294901760, %v179_v26  ;;  %v1493_v47 = vand.u32 4294901760, %v49_v42 }
  0x27   :  { %v130_v28 = vsub.f32 %v1428_v19, %v129_v24  ;;  %1155 = vmatprep.subr.mxu0 %v1348_v0  ;;  %v187_v33 = vand.u32 4294901760, %v186_v30  ;;  %v1498_v48 = vsub.f32 %v50_v40, %v1480_v44  ;;  %v652_v49 = vand.u32 4294901760, %v1478_v43  ;;  %p1326_p0 = pnand %p1325_p13, %p1319_p10 }
  0x28   :  { %1145 = vmatpush3.msra.mxu1 %v166_v27  ;;  %v617_v50 = vand.u32 4294901760, %v1483_v45  ;;  %v1509_v51 = vsub.f32 %v49_v42, %v1493_v47  ;;  %v659_v52 = vand.u32 4294901760, %v1491_v46 }
  0x29   :  { %v131_v31 = vand.u32 4294901760, %v130_v28  ;;  %1146 = vmatprep.subr.mxu1 %v1348_v0  ;;  %v653_v53 = vsub.f32 %v1478_v43, %v652_v49  ;;  %v666_v55 = vand.u32 4294901760, %v1498_v48 }
  0x2a   :  { %1147 = vmatpush3.msra.mxu1 %v173_v29  ;;  %v618_v54 = vsub.f32 %v1483_v45, %v617_v50  ;;  %v660_v56 = vsub.f32 %v1491_v46, %v659_v52  ;;  %v673_v57 = vand.u32 4294901760, %v1509_v51 }
  0x2b   :  { %1142 = vmatmul.mubr.f32.vlgmr.msra.gmra.mxu0 %v131_v31  ;;  %1148 = vmatprep.subr.mxu1 %v1348_v0  ;;  %v654_v58 = vand.u32 4294901760, %v653_v53  ;;  %v667_v60 = vsub.f32 %v1498_v48, %v666_v55 }
  0x2c   :  { %1156 = vmatpush3.msra.mxu0 %v163_v13  ;;  %1149 = vmatpush3.msra.mxu1 %v180_v32  ;;  %v619_v59 = vand.u32 4294901760, %v618_v54  ;;  %v661_v61 = vand.u32 4294901760, %v660_v56  ;;  %v674_v62 = vsub.f32 %v1509_v51, %v673_v57 }
  0x2d   :  { %1157 = vmatprep.subr.mxu0 %v1348_v0  ;;  %1150 = vmatprep.subr.mxu1 %v1348_v0  ;;  %v668_v63 = vand.u32 4294901760, %v667_v60 }
  0x2e   :  { %1158 = vmatpush3.msra.mxu0 %v1415_v15  ;;  %1151 = vmatpush3.msra.mxu1 %v187_v33  ;;  %v675_v1 = vand.u32 4294901760, %v674_v62 }
  0x2f   :  { %1159 = vmatprep.subr.mxu0 %v1348_v0  ;;  %1153 = vmatmul.mubr.f32.vlgmr.msra.gmra.mxu1 %v1412_v14 }
  0x30   :  { %1160 = vmatpush3.msra.mxu0 %v1420_v16  ;;  %1166 = vmatprep.subr.mxu1 %v1348_v0 }
  0x31   :  { %1161 = vmatprep.subr.mxu0 %v1348_v0  ;;  %1163 = vmatprep.mubr.msk.f32.mxu0 %vm1349_vm0, %v1348_v0 }
  0x32   :  { %1162 = vmatpush3.msra.mxu0 %v1424_v17  ;;  %1167 = vmatpush3.msra.mxu1 %v1391_v5 }
  0x33   :  { %1164 = vmatmul.mubr.f32.vlgmr.msra.gmra.mxu0 %v1428_v19  ;;  %1168 = vmatprep.subr.mxu1 %v1348_v0 }
  0x34   :  { %1177 = vmatprep.subr.mxu0 %v1348_v0  ;;  %1169 = vmatpush3.msra.mxu1 %v1393_v6 }
  0x35   :  { %1178 = vmatpush3.msra.mxu0 %v164_v18  ;;  %1170 = vmatprep.subr.mxu1 %v1348_v0 }
  0x36   :  { %1179 = vmatprep.subr.mxu0 %v1348_v0  ;;  %1171 = vmatpush3.msra.mxu1 %v1396_v7 }
  0x37   :  { %1180 = vmatpush3.msra.mxu0 %v171_v20  ;;  %1172 = vmatprep.subr.mxu1 %v1348_v0 }
  0x38   :  { %1181 = vmatprep.subr.mxu0 %v1348_v0  ;;  %1173 = vmatpush3.msra.mxu1 %v1404_v10 }
  0x39   :  { %1174 = vmatprep.mubr.msk.f32.mxu1 %vm1349_vm0, %v1348_v0  ;;  %1182 = vmatpush3.msra.mxu0 %v178_v21 }
  0x3a   :  { %1175 = vmatmul.mubr.f32.vlgmr.msra.gmra.mxu1 %v129_v24  ;;  %1183 = vmatprep.subr.mxu0 %v1348_v0 }
  0x3b   :  { %1188 = vmatprep.subr.mxu1 %v1348_v0  ;;  %1184 = vmatpush3.msra.mxu0 %v185_v22 }
  0x3c   :  { %1185 = vmatprep.mubr.msk.f32.mxu0 %vm1349_vm0, %v1348_v0  ;;  %1189 = vmatpush3.msra.mxu1 %v1391_v5 }
  0x3d   :  { %1186 = vmatmul.mubr.f32.vlgmr.msra.gmra.mxu0 %v1412_v14  ;;  %1190 = vmatprep.subr.mxu1 %v1348_v0 }
  0x3e   :  { %1199 = vmatprep.subr.mxu0 %v1348_v0  ;;  %1191 = vmatpush3.msra.mxu1 %v1393_v6 }
  0x3f   :  { %1200 = vmatpush3.msra.mxu0 %v1463_v39  ;;  %1192 = vmatprep.subr.mxu1 %v1348_v0 }
  0x40   :  { %1201 = vmatprep.subr.mxu0 %v1348_v0  ;;  %1193 = vmatpush3.msra.mxu1 %v1396_v7 }
  0x41   :  { %1202 = vmatpush3.msra.mxu0 %v1470_v41  ;;  %1194 = vmatprep.subr.mxu1 %v1348_v0 }
  0x42   :  { %1203 = vmatprep.subr.mxu0 %v1348_v0  ;;  %1195 = vmatpush3.msra.mxu1 %v1404_v10 }
  0x43   :  { %1196 = vmatprep.mubr.msk.f32.mxu1 %vm1349_vm0, %v1348_v0  ;;  %1204 = vmatpush3.msra.mxu0 %v1480_v44 }
  0x44   :  { %1197 = vmatmul.mubr.f32.vlgmr.msra.gmra.mxu1 %v1412_v14  ;;  %1205 = vmatprep.subr.mxu0 %v1348_v0 }
  0x45   :  { %1210 = vmatprep.subr.mxu1 %v1348_v0  ;;  %1206 = vmatpush3.msra.mxu0 %v1493_v47 }
  0x46   :  { %1207 = vmatprep.mubr.msk.f32.mxu0 %vm1349_vm0, %v1348_v0  ;;  %1211 = vmatpush3.msra.mxu1 %v654_v58 }
  0x47   :  { %1208 = vmatmul.mubr.f32.vlgmr.msra.gmra.mxu0 %v619_v59  ;;  %1212 = vmatprep.subr.mxu1 %v1348_v0 }
  0x48   :  { %1221 = vmatprep.subr.mxu0 %v1348_v0  ;;  %1213 = vmatpush3.msra.mxu1 %v661_v61 }
  0x49   :  { %1222 = vmatpush3.msra.mxu0 %v1478_v43  ;;  %1214 = vmatprep.subr.mxu1 %v1348_v0 }
  0x4a   :  { %1223 = vmatprep.subr.mxu0 %v1348_v0  ;;  %1215 = vmatpush3.msra.mxu1 %v668_v63 }
  0x4b   :  { %1224 = vmatpush3.msra.mxu0 %v1491_v46  ;;  %1216 = vmatprep.subr.mxu1 %v1348_v0 }
  0x4c   :  { %1225 = vmatprep.subr.mxu0 %v1348_v0  ;;  %1217 = vmatpush3.msra.mxu1 %v675_v1 }
  0x4d   :  { %1218 = vmatprep.mubr.msk.f32.mxu1 %vm1349_vm0, %v1348_v0  ;;  %1226 = vmatpush3.msra.mxu0 %v1498_v48 }
  0x4e   :  { %1219 = vmatmul.mubr.f32.vlgmr.msra.gmra.mxu1 %v1459_v38  ;;  %1227 = vmatprep.subr.mxu0 %v1348_v0 }
  0x4f   :  { %1232 = vmatprep.subr.mxu1 %v1348_v0  ;;  %1228 = vmatpush3.msra.mxu0 %v1509_v51 }
  0x50   :  { %1229 = vmatprep.mubr.msk.f32.mxu0 %vm1349_vm0, %v1348_v0  ;;  %1233 = vmatpush3.msra.mxu1 %v1463_v39 }
  0x51   :  { %1230 = vmatmul.mubr.f32.vlgmr.msra.gmra.mxu0 %v1483_v45  ;;  %1234 = vmatprep.subr.mxu1 %v1348_v0 }
  0x52   :  { %1243 = vmatprep.subr.mxu0 %v1348_v0  ;;  %1235 = vmatpush3.msra.mxu1 %v1470_v41 }
  0x53   :  { %1244 = vmatpush3.msra.mxu0 %v652_v49  ;;  %1236 = vmatprep.subr.mxu1 %v1348_v0 }
  0x54   :  { %1245 = vmatprep.subr.mxu0 %v1348_v0  ;;  %1237 = vmatpush3.msra.mxu1 %v1480_v44 }
  0x55   :  { %1246 = vmatpush3.msra.mxu0 %v659_v52  ;;  %1238 = vmatprep.subr.mxu1 %v1348_v0 }
  0x56   :  { %1247 = vmatprep.subr.mxu0 %v1348_v0  ;;  %1239 = vmatpush3.msra.mxu1 %v1493_v47 }
  0x57   :  { %1240 = vmatprep.mubr.msk.f32.mxu1 %vm1349_vm0, %v1348_v0  ;;  %1248 = vmatpush3.msra.mxu0 %v666_v55 }
  0x58   :  { %1241 = vmatmul.mubr.f32.vlgmr.msra.gmra.mxu1 %v617_v50  ;;  %1249 = vmatprep.subr.mxu0 %v1348_v0 }
  0x59   :  { %1254 = vmatprep.subr.mxu1 %v1348_v0  ;;  %1250 = vmatpush3.msra.mxu0 %v673_v57 }
  0x5a   :  { %1251 = vmatprep.mubr.msk.f32.mxu0 %vm1349_vm0, %v1348_v0  ;;  %1255 = vmatpush3.msra.mxu1 %v1463_v39 }
  0x5b   :  { %1252 = vmatmul.mubr.f32.vlgmr.msra.gmra.mxu0 %v1459_v38  ;;  %1256 = vmatprep.subr.mxu1 %v1348_v0 }
  0x5c   :  { %1262 = vmatprep.mubr.msk.f32.mxu1 %vm1349_vm0, %v1348_v0  ;;  %1257 = vmatpush3.msra.mxu1 %v1470_v41 }
  0x5d   :  { %1258 = vmatprep.subr.mxu1 %v1348_v0 }
  0x5e   :  { %1259 = vmatpush3.msra.mxu1 %v1480_v44 }
  0x5f   :  { %1260 = vmatprep.subr.mxu1 %v1348_v0 }
  0x60   :  { %1261 = vmatpush3.msra.mxu1 %v1493_v47 }
  0x61   :  { %1263 = vmatmul.mubr.f32.vlgmr.msra.gmra.mxu1 %v1459_v38 }
  0x9c   :  { %v1035_v34 = vpop.permute.xlu0 %1034 }
  0xeb   :  { %v133_v2 = vpop.f32.mrf.mxu0 }
  0xed   :  { %v1143_v3 = vpop.f32.mrf.mxu0 }
  0xef   :  { %v224_v4 = vpop.f32.mrf.mxu1 }
  0xf0   :  { %v225_v13 = vadd.f32 %v224_v4, %v133_v2 }
  0xf1   :  { %v1154_v5 = vpop.f32.mrf.mxu1 }
  0xf3   :  { %v304_v6 = vpop.f32.mrf.mxu0 }
  0xf4   :  { %v305_v16 = vadd.f32 %v304_v6, %v225_v13 }
  0xf5   :  { %v1165_v7 = vpop.f32.mrf.mxu0 }
  0xfa   :  { %v381_v8 = vpop.f32.mrf.mxu1 }
  0xfb   :  { %v382_v17 = vadd.f32 %v381_v8, %v305_v16 }
  0xfc   :  { %v1176_v9 = vpop.f32.mrf.mxu1 }
  0xfd   :  { %v464_v10 = vpop.f32.mrf.mxu0 }
  0xfe   :  { %v465_v19 = vadd.f32 %v464_v10, %v382_v17 }
  0xff   :  { %v1187_v11 = vpop.f32.mrf.mxu0 }
 0x104   :  { %v539_v12 = vpop.f32.mrf.mxu1 }
 0x105   :  { %v540_v21 = vadd.f32 %v539_v12, %v465_v19 }
 0x106   :  { %v1198_v14 = vpop.f32.mrf.mxu1 }
 0x107   :  { %v621_v15 = vpop.f32.mrf.mxu0 }
 0x108   :  { %v622_v24 = vadd.f32 %v621_v15, %v540_v21 }
 0x109   :  { %v1209_v0 = vpop.f32.mrf.mxu0 }
 0x10e   :  { %v712_v18 = vpop.f32.mrf.mxu1 }
 0x10f   :  { %v713_v25 = vadd.f32 %v712_v18, %v622_v24 }
 0x110   :  { %v1220_v20 = vpop.f32.mrf.mxu1 }
 0x111   :  { %v792_v22 = vpop.f32.mrf.mxu0 }
 0x112   :  { %v793_v28 = vadd.f32 %v792_v22, %v713_v25 }
 0x113   :  { %v1231_v23 = vpop.f32.mrf.mxu0 }
 0x118   :  { %v869_v26 = vpop.f32.mrf.mxu1 }
 0x119   :  { %v870_v30 = vadd.f32 %v869_v26, %v793_v28 }
 0x11a   :  { %v1242_v27 = vpop.f32.mrf.mxu1 }
 0x11b   :  { %v952_v29 = vpop.f32.mrf.mxu0 }
 0x11c   :  { %v953_v32 = vadd.f32 %v952_v29, %v870_v30 }
 0x11d   :  { %v1253_v31 = vpop.f32.mrf.mxu0 }
 0x121   :  { %v1027_v33 = vpop.f32.mrf.mxu1 }
 0x122   :  { %v1028_v35 = vadd.f32 %v1027_v33, %v953_v32 }
 0x123   :  { %v1264_v36 = vpop.f32.mrf.mxu1 }
 0x124   :  { %v1037_v37 = vadd.f32 %v1035_v34, %v1028_v35 }
 0x126   :  { %v1038_v38 = vrot.slane %v1037_v37, 4 }
 0x128   :  { %v1039_v39 = vmax.f32 %v1037_v37, %v1038_v38 }
 0x12a   :  { %v1040_v40 = vrot.slane %v1039_v39, 2 }
 0x12c   :  { %v1041_v41 = vmax.f32 %v1039_v39, %v1040_v40 }
 0x12e   :  { %v1042_v42 = vrot.slane %v1041_v41, 1 }
 0x130   :  { %v1043_v43 = vmax.f32 %v1041_v41, %v1042_v42 }
 0x132   :  { %v1044_v44 = vsub.f32 %v1037_v37, %v1043_v43 }
 0x134   :  { %v1045_v45 = vmul.f32 1.442695, %v1044_v44 }
 0x136   :  { %1274 = vpow2.f32 %v1045_v45 }
 0x143   :  { %v1275_v46 = vpop.eup %1274 }
 0x144   :  { %v1047_v47 = vrot.slane %v1275_v46, 4 }
 0x146   :  { %v1048_v48 = vadd.f32 %v1275_v46, %v1047_v47 }
 0x148   :  { %v1049_v49 = vrot.slane %v1048_v48, 2 }
 0x14a   :  { %v1050_v50 = vadd.f32 %v1049_v49, %v1048_v48 }
 0x14c   :  { %v1051_v51 = vrot.slane %v1050_v50, 1 }
 0x14e   :  { %v1052_v52 = vadd.f32 %v1051_v51, %v1050_v50 }
 0x150   :  { %1276 = vlog2.f32 %v1052_v52 }
 0x15d   :  { %v1277_v53 = vpop.eup %1276 }
 0x15e   :  { %v1054_v54 = vmul.f32 0.6931472, %v1277_v53 }
 0x160   :  { %v1055_v55 = vadd.f32 %v1054_v54, %v1043_v43 }
 0x162   :  { %1056 = vst [vmem:[#allocation7] sm:$0x1] %v1055_v55 }
 0x163   :  { %1329 = shalt.err (!%p1326_p0)
}
 0x164   :  { %1066 = dma.vmem_to_hbm [thread:$0]  %s1064_s3, 16, %s1595_s4, [#allocation4]  }
 0x165   :  { %1342 = dma.done.wait [#allocation4], 16  }
 0x166   :  { %1343 = vsyncadd [#allocation4], 4294967280 }
 0x167   :  { %1070 = vsyncpa [#allocation3], 1 }
 0x168   :  { %1071 = vsyncpa [#allocation6], 1 }
 0x169   :  { %1072 = vsyncpa [#allocation4], 1 }

</bundles_post_ra>
